<compile_context>
chip_gen: v6e
topology: v6e:2x2x1
jax: 0.10.0
libtpu: 0.0.40
codegen_flags: <defaults>
</compile_context>

<pallas_src>
import jax
import jax.numpy as jnp
from jax import lax
from jax.experimental import pallas as pl
from jax.experimental.pallas import tpu as pltpu

HIDDEN = 128           # fixed by the module definition
LEAKY_SLOPE = 0.6
DROP_P = 0.5           # F.dropout default p=0.5, training=True


def policy_kernel(x_ref, w1_ref, w2_ref, u_ref, o_ref):
    # fc1: contract x (B, F) with w1 (128, F) over F  ->  (B, 128).
    # trans_b contraction is native on the MXU; weights stay in stored layout.
    h = lax.dot_general(
        x_ref[...], w1_ref[...],
        dimension_numbers=(((1,), (1,)), ((), ())),
        preferred_element_type=jnp.float32)

    # leaky_relu with negative_slope = 0.6
    h = jnp.where(h > 0, h, LEAKY_SLOPE * h)

    # dropout p=0.5 (training=True semantics): keep w.p. (1-p), scale by 1/(1-p)
    keep = u_ref[...] >= DROP_P
    h = jnp.where(keep, h * (1.0 / (1.0 - DROP_P)), 0.0)

    # fc2: contract h (B, 128) with w2_pad (O_pad, 128) over 128 -> (B, O_pad).
    logits = lax.dot_general(
        h, w2_ref[...],
        dimension_numbers=(((1,), (1,)), ((), ())),
        preferred_element_type=jnp.float32)

    # softmax over dim=0 (the batch axis): per-column, independent.
    m = jnp.max(logits, axis=0, keepdims=True)
    e = jnp.exp(logits - m)
    denom = jnp.sum(e, axis=0, keepdims=True)
    inv = 1.0 / denom                       # one divide per column, broadcast mul
    o_ref[...] = (e * inv).astype(o_ref.dtype)


def policy_forward(x, w1, w2, dropout_key):
    """x: (B, in_features) f32; w1: (128, in_features); w2: (out_size, 128)."""
    B, F = x.shape
    O = w2.shape[0]

    # Lane-dense output: pad W2's output rows up to a multiple of 128.
    # Padded rows are zero -> padded logits are 0 -> softmax gives 1/B there;
    # those columns are sliced off below.
    O_pad = max(HIDDEN, ((O + 127) // 128) * 128)
    w2_pad = jnp.pad(w2, ((0, O_pad - O), (0, 0)))

    # Dropout uniforms (one per hidden activation), generated host/XLA-side so
    # the kernel stays portable (no TPU-only PRNG primitives).
    u = jax.random.uniform(dropout_key, (B, HIDDEN), jnp.float32)

    out_pad = pl.pallas_call(
        policy_kernel,
        out_shape=jax.ShapeDtypeStruct((B, O_pad), jnp.float32),
        grid=(1,),
        in_specs=[
            pl.BlockSpec((B, F), lambda i: (0, 0)),
            pl.BlockSpec((HIDDEN, F), lambda i: (0, 0)),
            pl.BlockSpec((O_pad, HIDDEN), lambda i: (0, 0)),
            pl.BlockSpec((B, HIDDEN), lambda i: (0, 0)),
        ],
        out_specs=pl.BlockSpec((B, O_pad), lambda i: (0, 0)),
        compiler_params=pltpu.CompilerParams(
            dimension_semantics=("arbitrary",)),
    )(x, w1, w2_pad, u)

    return out_pad[:, :O]


if __name__ == "__main__":
    key = jax.random.PRNGKey(0)
    k_x, k_w1, k_w2, k_drop = jax.random.split(key, 4)

    B, in_features, out_size = 8, 32, 8

    # Deterministic parameter init (PyTorch Linear-style uniform bounds).
    bound1 = 1.0 / jnp.sqrt(jnp.float32(in_features))
    bound2 = 1.0 / jnp.sqrt(jnp.float32(HIDDEN))
    w1 = jax.random.uniform(k_w1, (HIDDEN, in_features), jnp.float32,
                            minval=-bound1, maxval=bound1)
    w2 = jax.random.uniform(k_w2, (out_size, HIDDEN), jnp.float32,
                            minval=-bound2, maxval=bound2)

    x = jax.random.normal(k_x, (B, in_features), jnp.float32)

    out = policy_forward(x, w1, w2, dropout_key=k_drop)
    out = jax.block_until_ready(out)

    assert out.shape == (B, out_size)
    # softmax over dim=0: each (real) column sums to 1
    col_sums = jnp.sum(out, axis=0)
    assert jnp.allclose(col_sums, jnp.ones_like(col_sums), atol=1e-5)
    assert bool(jnp.all(out >= 0.0))

    print("KERNEL_OK")
</pallas_src>

<mosaic_0001>
module attributes {stable_mosaic.version = 11 : i64} {
  func.func @policy_kernel(%arg0: i32, %arg1: memref<8x32xf32, #tpu.memory_space<vmem>>, %arg2: memref<128x32xf32, #tpu.memory_space<vmem>>, %arg3: memref<128x128xf32, #tpu.memory_space<vmem>>, %arg4: memref<8x128xf32, #tpu.memory_space<vmem>>, %arg5: memref<8x128xf32, #tpu.memory_space<vmem>>) attributes {dimension_semantics = [#tpu.dimension_semantics<arbitrary>], iteration_bounds = array<i64: 1>, scalar_prefetch = 0 : i64, scratch_operands = 0 : i64, tpu.core_type = #tpu.core_type<tc>, window_params = [{pipeline_mode = #tpu.pipeline_mode<synchronous>, transform_indices = @transform_0, window_bounds = array<i64: 8, 32>}, {pipeline_mode = #tpu.pipeline_mode<synchronous>, transform_indices = @transform_1, window_bounds = array<i64: 128, 32>}, {pipeline_mode = #tpu.pipeline_mode<synchronous>, transform_indices = @transform_2, window_bounds = array<i64: 128, 128>}, {pipeline_mode = #tpu.pipeline_mode<synchronous>, transform_indices = @transform_3, window_bounds = array<i64: 8, 128>}, {pipeline_mode = #tpu.pipeline_mode<synchronous>, transform_indices = @transform_4, window_bounds = array<i64: 8, 128>}]} {
    %c0 = arith.constant 0 : index
    %c0_0 = arith.constant 0 : index
    %0 = vector.load %arg1[%c0, %c0_0] : memref<8x32xf32, #tpu.memory_space<vmem>>, vector<8x32xf32>
    %c0_1 = arith.constant 0 : index
    %c0_2 = arith.constant 0 : index
    %1 = vector.load %arg2[%c0_1, %c0_2] : memref<128x32xf32, #tpu.memory_space<vmem>>, vector<128x32xf32>
    %cst = arith.constant dense<0.000000e+00> : vector<8x128xf32>
    %2 = tpu.matmul %0, %1, %cst {dimension_numbers = #tpu.dot_dimension_numbers<[1], [1], [0], [0], [0, 0, 1, 0], [], []>} : vector<8x32xf32>, vector<128x32xf32>, vector<8x128xf32> -> vector<8x128xf32>
    %cst_3 = arith.constant 0.000000e+00 : f32
    %3 = vector.broadcast %cst_3 : f32 to vector<8x128xf32>
    %4 = arith.cmpf ogt, %2, %3 : vector<8x128xf32>
    %cst_4 = arith.constant 6.000000e-01 : f32
    %5 = vector.broadcast %cst_4 : f32 to vector<8x128xf32>
    %6 = arith.mulf %5, %2 : vector<8x128xf32>
    %7 = arith.select %4, %2, %6 : vector<8x128xi1>, vector<8x128xf32>
    %c0_5 = arith.constant 0 : index
    %c0_6 = arith.constant 0 : index
    %8 = vector.load %arg4[%c0_5, %c0_6] : memref<8x128xf32, #tpu.memory_space<vmem>>, vector<8x128xf32>
    %cst_7 = arith.constant 5.000000e-01 : f32
    %9 = vector.broadcast %cst_7 : f32 to vector<8x128xf32>
    %10 = arith.cmpf oge, %8, %9 : vector<8x128xf32>
    %cst_8 = arith.constant 2.000000e+00 : f32
    %11 = vector.broadcast %cst_8 : f32 to vector<8x128xf32>
    %12 = arith.mulf %7, %11 : vector<8x128xf32>
    %cst_9 = arith.constant 0.000000e+00 : f32
    %13 = vector.broadcast %cst_9 : f32 to vector<8x128xf32>
    %14 = arith.select %10, %12, %13 : vector<8x128xi1>, vector<8x128xf32>
    %c0_10 = arith.constant 0 : index
    %c0_11 = arith.constant 0 : index
    %15 = vector.load %arg3[%c0_10, %c0_11] : memref<128x128xf32, #tpu.memory_space<vmem>>, vector<128x128xf32>
    %cst_12 = arith.constant dense<0.000000e+00> : vector<8x128xf32>
    %16 = tpu.matmul %14, %15, %cst_12 {dimension_numbers = #tpu.dot_dimension_numbers<[1], [1], [0], [0], [0, 0, 1, 0], [], []>} : vector<8x128xf32>, vector<128x128xf32>, vector<8x128xf32> -> vector<8x128xf32>
    %cst_13 = arith.constant dense<0xFF800000> : vector<128xf32>
    %17 = vector.multi_reduction <maximumf>, %16, %cst_13 [0] : vector<8x128xf32> to vector<128xf32>
    %18 = vector.shape_cast %17 : vector<128xf32> to vector<1x128xf32>
    %19 = vector.broadcast %18 : vector<1x128xf32> to vector<8x128xf32>
    %20 = arith.subf %16, %19 : vector<8x128xf32>
    %21 = math.exp %20 : vector<8x128xf32>
    %cst_14 = arith.constant dense<0.000000e+00> : vector<128xf32>
    %22 = vector.multi_reduction <add>, %21, %cst_14 [0] : vector<8x128xf32> to vector<128xf32>
    %23 = vector.shape_cast %22 : vector<128xf32> to vector<1x128xf32>
    %cst_15 = arith.constant 1.000000e+00 : f32
    %24 = vector.broadcast %cst_15 : f32 to vector<1x128xf32>
    %25 = arith.divf %24, %23 : vector<1x128xf32>
    %26 = vector.broadcast %25 : vector<1x128xf32> to vector<8x128xf32>
    %27 = arith.mulf %21, %26 : vector<8x128xf32>
    %c0_16 = arith.constant 0 : index
    %c0_17 = arith.constant 0 : index
    %28 = vector.load %arg5[%c0_16, %c0_17] : memref<8x128xf32, #tpu.memory_space<vmem>>, vector<8x128xf32>
    tpu.vector_store %arg5[%c0_16, %c0_17], %27 {strides = array<i32>} : memref<8x128xf32, #tpu.memory_space<vmem>>, vector<8x128xf32>,
    return
  }
  func.func @transform_0(%arg0: i32) -> (i32, i32) {
    %c0_i32 = arith.constant 0 : i32
    %c0_i32_0 = arith.constant 0 : i32
    %c0_i32_1 = arith.constant 0 : i32
    return %c0_i32, %c0_i32_0 : i32, i32
  }
  func.func @transform_1(%arg0: i32) -> (i32, i32) {
    %c0_i32 = arith.constant 0 : i32
    %c0_i32_0 = arith.constant 0 : i32
    %c0_i32_1 = arith.constant 0 : i32
    return %c0_i32, %c0_i32_0 : i32, i32
  }
  func.func @transform_2(%arg0: i32) -> (i32, i32) {
    %c0_i32 = arith.constant 0 : i32
    %c0_i32_0 = arith.constant 0 : i32
    %c0_i32_1 = arith.constant 0 : i32
    return %c0_i32, %c0_i32_0 : i32, i32
  }
  func.func @transform_3(%arg0: i32) -> (i32, i32) {
    %c0_i32 = arith.constant 0 : i32
    %c0_i32_0 = arith.constant 0 : i32
    %c0_i32_1 = arith.constant 0 : i32
    return %c0_i32, %c0_i32_0 : i32, i32
  }
  func.func @transform_4(%arg0: i32) -> (i32, i32) {
    %c0_i32 = arith.constant 0 : i32
    %c0_i32_0 = arith.constant 0 : i32
    %c0_i32_1 = arith.constant 0 : i32
    return %c0_i32, %c0_i32_0 : i32, i32
  }
}

</mosaic_0001>

<bundles_post_ra>
// kernel: tpu_custom_call.1
= control target key start
LH: loop header
LB: loop body
LE: loop exit
PB: predicated region body
PF: predicated region fallthrough
CT: control target
= control target key end

     0   :  { %vm35_vm0 = vcmask 261120   ;;  %v434_v1 = vmov 0.0   ;;  %vm435_vm1 = vmmov 0   ;;  %s618_s0 = inlined_call_operand.vmem [shape: f32[8,32], index: 0, kind: input, shape index: {}]   ;;  %s619_s1 = inlined_call_operand.vmem [shape: f32[128,32], index: 1, kind: input, shape index: {}]   ;;  %s620_s2 = inlined_call_operand.vmem [shape: f32[128,128], index: 2, kind: input, shape index: {}]   ;;  %s621_s3 = inlined_call_operand.vmem [shape: f32[8,128], index: 3, kind: input, shape index: {}]   ;;  %s622_s4 = inlined_call_operand.hbm [shape: f32[8,128], index: 4, kind: output, shape index: {}]  }
   0x1   :  { %v34_v0 = vld [vmem:[%s619_s1 + $0x78] sm:$0xff]  ;;  %335 = vmatprep.subr.mxu0 %v434_v1  ;;  %367 = vmatprep.mubr.msk.f32.mxu0 %vm435_vm1, %v434_v1  ;;  %v33_v2 = vld [vmem:[%s619_s1 + $0x70] sm:$0xff]  ;;  %v32_v4 = vld [vmem:[%s619_s1 + $0x68] sm:$0xff] }
   0x2   :  { %336 = vmatpush3.xpose.msk.msra.mxu0 %vm35_vm0, %v34_v0  ;;  %370 = vmatprep.subr.mxu1 %v434_v1  ;;  %v179_v3 = vld [vmem:[%s620_s2 + $0x78] sm:$0xff]  ;;  %v178_v5 = vld [vmem:[%s620_s2 + $0x70] sm:$0xff] }
   0x3   :  { %337 = vmatprep.subr.mxu0 %v434_v1  ;;  %402 = vmatprep.mubr.msk.f32.mxu1 %vm435_vm1, %v434_v1 }
   0x4   :  { %371 = vmatpush3.xpose.msra.mxu1 %v179_v3 }
   0x5   :  { %372 = vmatprep.subr.mxu1 %v434_v1 }
   0x6   :  { %338 = vmatpush3.xpose.msk.msra.mxu0 %vm35_vm0, %v33_v2 }
   0x7   :  { %339 = vmatprep.subr.mxu0 %v434_v1 }
   0x8   :  { %373 = vmatpush3.xpose.msra.mxu1 %v178_v5 }
   0xa   :  { %340 = vmatpush3.xpose.msk.msra.mxu0 %vm35_vm0, %v32_v4 }
   0xb   :  { %9 = vsyncpa [#allocation3], 0  ;;  %341 = vmatprep.subr.mxu0 %v434_v1  ;;  %v31_v6 = vld [vmem:[%s619_s1 + $0x60] sm:$0xff]  ;;  %374 = vmatprep.subr.mxu1 %v434_v1  ;;  %v177_v7 = vld [vmem:[%s620_s2 + $0x68] sm:$0xff] }
   0xc   :  { %375 = vmatpush3.xpose.msra.mxu1 %v177_v7  ;;  %v30_v8 = vld [vmem:[%s619_s1 + $0x58] sm:$0xff]  ;;  %v176_v9 = vld [vmem:[%s620_s2 + $0x60] sm:$0xff]  ;;  %v29_v10 = vld [vmem:[%s619_s1 + $0x50] sm:$0xff] }
   0xd   :  { %376 = vmatprep.subr.mxu1 %v434_v1  ;;  %v175_v11 = vld [vmem:[%s620_s2 + $0x58] sm:$0xff]  ;;  %v28_v12 = vld [vmem:[%s619_s1 + $0x48] sm:$0xff]  ;;  %v174_v13 = vld [vmem:[%s620_s2 + $0x50] sm:$0xff] }
   0xe   :  { %342 = vmatpush3.xpose.msk.msra.mxu0 %vm35_vm0, %v31_v6  ;;  %v27_v14 = vld [vmem:[%s619_s1 + $0x40] sm:$0xff]  ;;  %v173_v15 = vld [vmem:[%s620_s2 + $0x48] sm:$0xff]  ;;  %v26_v16 = vld [vmem:[%s619_s1 + $0x38] sm:$0xff] }
   0xf   :  { %343 = vmatprep.subr.mxu0 %v434_v1  ;;  %v172_v17 = vld [vmem:[%s620_s2 + $0x40] sm:$0xff]  ;;  %v25_v18 = vld [vmem:[%s619_s1 + $0x30] sm:$0xff]  ;;  %v171_v19 = vld [vmem:[%s620_s2 + $0x38] sm:$0xff] }
  0x10   :  { %377 = vmatpush3.xpose.msra.mxu1 %v176_v9  ;;  %v24_v20 = vld [vmem:[%s619_s1 + $0x28] sm:$0xff]  ;;  %v170_v21 = vld [vmem:[%s620_s2 + $0x30] sm:$0xff]  ;;  %v23_v22 = vld [vmem:[%s619_s1 + $0x20] sm:$0xff] }
  0x11   :  { %378 = vmatprep.subr.mxu1 %v434_v1  ;;  %v169_v23 = vld [vmem:[%s620_s2 + $0x28] sm:$0xff]  ;;  %v22_v24 = vld [vmem:[%s619_s1 + $0x18] sm:$0xff]  ;;  %v168_v25 = vld [vmem:[%s620_s2 + $0x20] sm:$0xff] }
  0x12   :  { %344 = vmatpush3.xpose.msk.msra.mxu0 %vm35_vm0, %v30_v8  ;;  %v21_v26 = vld [vmem:[%s619_s1 + $0x10] sm:$0xff]  ;;  %v167_v27 = vld [vmem:[%s620_s2 + $0x18] sm:$0xff]  ;;  %v20_v28 = vld [vmem:[%s619_s1 + $0x8] sm:$0xff] }
  0x13   :  { %345 = vmatprep.subr.mxu0 %v434_v1  ;;  %v166_v29 = vld [vmem:[%s620_s2 + $0x10] sm:$0xff]  ;;  %v19_v30 = vld [vmem:[%s619_s1] sm:$0xff]  ;;  %v165_v31 = vld [vmem:[%s620_s2 + $0x8] sm:$0xff] }
  0x14   :  { %379 = vmatpush3.xpose.msra.mxu1 %v175_v11  ;;  %v18_v32 = vld [vmem:[%s618_s0] sm:$0xff]  ;;  %s436_s0 = smov [#allocation2]  }
  0x15   :  { %380 = vmatprep.subr.mxu1 %v434_v1  ;;  %v164_v33 = vld [vmem:[%s620_s2] sm:$0xff]  ;;  %s275_s2 = sshll.u32 %s436_s0, 4  ;;  %s276_s2 = int_to_ptr.vmem [resolvable:$true] %s275_s2 }
  0x16   :  { %346 = vmatpush3.xpose.msk.msra.mxu0 %vm35_vm0, %v29_v10  ;;  %v160_v35 = vld [vmem:[%s621_s3] sm:$0xff]  ;;  %s412_s3 = scalar_lea.vmem %s276_s2, 128  ;;  %p417_p1 = scmp.lt.s32.totalorder %s276_s2, %s276_s2 }
  0x17   :  { %347 = vmatprep.subr.mxu0 %v434_v1  ;;  %vm161_vm3 = vcmp.ge.f32.partialorder %v160_v35, 0.5  ;;  %p413_p0 = scmp.ne.s32.totalorder %s276_s2, %s412_s3  ;;  %p418_p2 = scmp.lt.s32.totalorder %s412_s3, %s412_s3 }
  0x18   :  { %381 = vmatpush3.xpose.msra.mxu1 %v174_v13 }
  0x19   :  { %382 = vmatprep.subr.mxu1 %v434_v1  ;;  %p419_p3 = por %p418_p2, %p417_p1 }
  0x1a   :  { %348 = vmatpush3.xpose.msk.msra.mxu0 %vm35_vm0, %v28_v12 }
  0x1b   :  { %349 = vmatprep.subr.mxu0 %v434_v1  ;;  %p420_p4 = pnand %p419_p3, %p413_p0 }
  0x1c   :  { %383 = vmatpush3.xpose.msra.mxu1 %v173_v15 }
  0x1d   :  { %384 = vmatprep.subr.mxu1 %v434_v1 }
  0x1e   :  { %350 = vmatpush3.xpose.msk.msra.mxu0 %vm35_vm0, %v27_v14 }
  0x1f   :  { %351 = vmatprep.subr.mxu0 %v434_v1 }
  0x20   :  { %385 = vmatpush3.xpose.msra.mxu1 %v172_v17 }
  0x21   :  { %386 = vmatprep.subr.mxu1 %v434_v1 }
  0x22   :  { %352 = vmatpush3.xpose.msk.msra.mxu0 %vm35_vm0, %v26_v16 }
  0x23   :  { %353 = vmatprep.subr.mxu0 %v434_v1 }
  0x24   :  { %387 = vmatpush3.xpose.msra.mxu1 %v171_v19 }
  0x25   :  { %388 = vmatprep.subr.mxu1 %v434_v1 }
  0x26   :  { %354 = vmatpush3.xpose.msk.msra.mxu0 %vm35_vm0, %v25_v18 }
  0x27   :  { %355 = vmatprep.subr.mxu0 %v434_v1 }
  0x28   :  { %389 = vmatpush3.xpose.msra.mxu1 %v170_v21 }
  0x29   :  { %390 = vmatprep.subr.mxu1 %v434_v1 }
  0x2a   :  { %356 = vmatpush3.xpose.msk.msra.mxu0 %vm35_vm0, %v24_v20 }
  0x2b   :  { %357 = vmatprep.subr.mxu0 %v434_v1 }
  0x2c   :  { %391 = vmatpush3.xpose.msra.mxu1 %v169_v23 }
  0x2d   :  { %392 = vmatprep.subr.mxu1 %v434_v1 }
  0x2e   :  { %358 = vmatpush3.xpose.msk.msra.mxu0 %vm35_vm0, %v23_v22 }
  0x2f   :  { %359 = vmatprep.subr.mxu0 %v434_v1 }
  0x30   :  { %393 = vmatpush3.xpose.msra.mxu1 %v168_v25 }
  0x31   :  { %394 = vmatprep.subr.mxu1 %v434_v1 }
  0x32   :  { %360 = vmatpush3.xpose.msk.msra.mxu0 %vm35_vm0, %v22_v24 }
  0x33   :  { %361 = vmatprep.subr.mxu0 %v434_v1 }
  0x34   :  { %395 = vmatpush3.xpose.msra.mxu1 %v167_v27 }
  0x35   :  { %396 = vmatprep.subr.mxu1 %v434_v1 }
  0x36   :  { %362 = vmatpush3.xpose.msk.msra.mxu0 %vm35_vm0, %v21_v26 }
  0x37   :  { %363 = vmatprep.subr.mxu0 %v434_v1 }
  0x38   :  { %397 = vmatpush3.xpose.msra.mxu1 %v166_v29 }
  0x39   :  { %398 = vmatprep.subr.mxu1 %v434_v1 }
  0x3a   :  { %364 = vmatpush3.xpose.msk.msra.mxu0 %vm35_vm0, %v20_v28 }
  0x3b   :  { %365 = vmatprep.subr.mxu0 %v434_v1 }
  0x3c   :  { %399 = vmatpush3.xpose.msra.mxu1 %v165_v31 }
  0x3d   :  { %400 = vmatprep.subr.mxu1 %v434_v1 }
  0x3e   :  { %366 = vmatpush3.xpose.msk.msra.mxu0 %vm35_vm0, %v19_v30 }
  0x40   :  { %401 = vmatpush3.xpose.msra.mxu1 %v164_v33 }
  0x41   :  { %368 = vmatmul.mubr.msk.f32.vlgmr.msra.gmra.mxu0 %vm35_vm0, %v18_v32 }
 0x101   :  { %v153_v34 = vpop.f32.mrf.mxu0 }
 0x102   :  { %vm157_vm2 = vcmp.gt.f32.partialorder %v153_v34, 0.0  ;;  %v158_v36 = vmul.f32 0.6, %v153_v34 }
 0x103   :  { %v369_v37 = vpop.f32.mrf.mxu0 }
 0x104   :  { %v159_v38 = vsel %vm157_vm2, %v153_v34, %v158_v36 }
 0x105   :  { %v162_v39 = vmul.f32 2.0, %v159_v38 }
 0x107   :  { %403 = vmatmul.mubr.msk.f32.vlgmr.msra.gmra.mxu1 %vm161_vm3, %v162_v39 }
 0x1c7   :  { %v246_v40 = vpop.f32.mrf.mxu1 }
 0x1c8   :  { %v250_v41 = vrot.slane %v246_v40, 4 }
 0x1c9   :  { %v404_v42 = vpop.f32.mrf.mxu1 }
 0x1ca   :  { %v251_v43 = vmax.f32 %v246_v40, %v250_v41 }
 0x1cc   :  { %v252_v44 = vrot.slane %v251_v43, 2 }
 0x1ce   :  { %v253_v45 = vmax.f32 %v251_v43, %v252_v44 }
 0x1d0   :  { %v254_v46 = vrot.slane %v253_v45, 1 }
 0x1d2   :  { %v255_v47 = vmax.f32 %v253_v45, %v254_v46 }
 0x1d4   :  { %v256_v48 = vsub.f32 %v246_v40, %v255_v47 }
 0x1d6   :  { %v257_v49 = vmul.f32 1.442695, %v256_v48 }
 0x1d8   :  { %408 = vpow2.f32 %v257_v49 }
 0x1e5   :  { %v409_v50 = vpop.eup %408 }
 0x1e6   :  { %v259_v51 = vrot.slane %v409_v50, 4 }
 0x1e8   :  { %v260_v52 = vadd.f32 %v409_v50, %v259_v51 }
 0x1ea   :  { %v261_v53 = vrot.slane %v260_v52, 2 }
 0x1ec   :  { %v262_v54 = vadd.f32 %v261_v53, %v260_v52 }
 0x1ee   :  { %v263_v55 = vrot.slane %v262_v54, 1 }
 0x1f0   :  { %v264_v56 = vadd.f32 %v263_v55, %v262_v54 }
 0x1f2   :  { %410 = vrcp.f32 %v264_v56 }
 0x1ff   :  { %v411_v57 = vpop.eup %410 }
 0x200   :  { %v267_v58 = vmul.f32 %v411_v57, %v409_v50 }
 0x202   :  { %268 = vst [vmem:[#allocation2] sm:$0xff] %v267_v58 }
 0x203   :  { %423 = shalt.err (!%p420_p4)
}
 0x204   :  { %278 = dma.vmem_to_hbm [thread:$0]  %s276_s2, 128, %s622_s4, [#allocation3]  }
 0x205   :  { %432 = dma.done.wait [#allocation3], 128  }
 0x206   :  { %433 = vsyncadd [#allocation3], 4294967168 }
 0x207   :  { %282 = vsyncpa [#allocation3], 1 }

</bundles_post_ra>
